<compile_context>
chip_gen: v5e
topology: v5e:2x2
jax: 0.10.0
libtpu: 0.0.40
codegen_flags: <defaults>
</compile_context>

<pallas_src>
import jax
import jax.numpy as jnp
from jax.experimental import pallas as pl
from jax.experimental.pallas import tpu as pltpu

INPUT_DIM = 128
LATENT_DIM = 32
NUM_CLASSES = 5
HIDDEN_FE = INPUT_DIM // 2      # 64
HIDDEN_RC = LATENT_DIM * 2      # 64
HIDDEN_CL = LATENT_DIM // 2     # 16

# latent and logits share one lane-dense (*, 128) output slab:
#   lanes [0:32) -> latent, lanes [32:37) -> logits, remaining lanes are zero.
PACK_WIDTH = 128

_PARAM_ORDER = ("w1", "b1", "w2", "b2", "w3", "b3", "w4", "b4", "w5", "b5", "w6", "b6")


def _round_up(n, m):
    return (n + m - 1) // m * m


def _aux_kernel(x_ref,
                w1_ref, b1_ref, w2_ref, b2_ref,       # feature extractor (w2/b2 padded to 128 lanes)
                w3_ref, b3_ref, w4_ref, b4_ref,       # reconstructor   (w3 padded to 128 input rows)
                w5_ref, b5_ref, w6_ref, b6_ref,       # classifier      (w5 padded rows, w6/b6 at lane 32)
                recon_ref, packed_ref):
    bf16 = jnp.bfloat16
    # Single conversion point: MXU operands are bf16, accumulation + bias/ReLU stay f32.
    x = x_ref[...].astype(bf16)                       # no-op when x arrives as bf16

    # ---- feature extractor: Linear(128,64) -> ReLU -> Linear(64,32 padded to 128) ----
    h1 = jnp.dot(x, w1_ref[...], preferred_element_type=jnp.float32) + b1_ref[...]
    h1 = jnp.maximum(h1, 0.0).astype(bf16)
    # latent lives in lanes 0:32 of a 128-wide slab; lanes 32: are exactly zero.
    latent_wide = jnp.dot(h1, w2_ref[...], preferred_element_type=jnp.float32) + b2_ref[...]
    lat_bf = latent_wide.astype(bf16)

    # ---- reconstructor: Linear(32,64) -> ReLU -> Linear(64,128) ----
    # w3 is zero-padded to 128 input rows so latent_wide feeds it directly.
    h2 = jnp.dot(lat_bf, w3_ref[...], preferred_element_type=jnp.float32) + b3_ref[...]
    h2 = jnp.maximum(h2, 0.0).astype(bf16)
    recon = jnp.dot(h2, w4_ref[...], preferred_element_type=jnp.float32) + b4_ref[...]
    recon_ref[...] = recon.astype(recon_ref.dtype)

    # ---- classifier (detached latent: forward values identical): 32 -> 16 -> 5 ----
    h3 = jnp.dot(lat_bf, w5_ref[...], preferred_element_type=jnp.float32) + b5_ref[...]
    h3 = jnp.maximum(h3, 0.0).astype(bf16)
    # w6/b6 place the 5 logit columns at lane offset LATENT_DIM; all other lanes zero.
    logits_wide = jnp.dot(h3, w6_ref[...], preferred_element_type=jnp.float32) + b6_ref[...]

    # Lane-dense packed store: latent in lanes 0:32, logits in lanes 32:37 (pure VPU add).
    packed_ref[...] = (latent_wide + logits_wide).astype(packed_ref.dtype)


def prepare_params(params, weight_dtype=jnp.bfloat16):
    """One-time (outside the hot path) bf16 cast + zero-padding of the weights into
    the lane-dense packed layout the kernel expects. Biases stay f32 (added after
    the f32 accumulation)."""
    f32 = jnp.float32
    w2p = jnp.zeros((HIDDEN_FE, PACK_WIDTH), f32).at[:, :LATENT_DIM].set(params["w2"])
    b2p = jnp.zeros((1, PACK_WIDTH), f32).at[:, :LATENT_DIM].set(params["b2"])
    w3p = jnp.zeros((PACK_WIDTH, HIDDEN_RC), f32).at[:LATENT_DIM, :].set(params["w3"])
    w5p = jnp.zeros((PACK_WIDTH, HIDDEN_CL), f32).at[:LATENT_DIM, :].set(params["w5"])
    w6p = jnp.zeros((HIDDEN_CL, PACK_WIDTH), f32).at[
        :, LATENT_DIM:LATENT_DIM + NUM_CLASSES].set(params["w6"])
    b6p = jnp.zeros((1, PACK_WIDTH), f32).at[
        :, LATENT_DIM:LATENT_DIM + NUM_CLASSES].set(params["b6"])
    prepped = {
        "w1": params["w1"], "b1": params["b1"],
        "w2": w2p, "b2": b2p,
        "w3": w3p, "b3": params["b3"],
        "w4": params["w4"], "b4": params["b4"],
        "w5": w5p, "b5": params["b5"],
        "w6": w6p, "b6": b6p,
    }
    for k in prepped:
        if k.startswith("w"):
            prepped[k] = prepped[k].astype(weight_dtype)   # bf16 MXU operands
        else:
            prepped[k] = prepped[k].astype(f32)
    return prepped


def auxiliary_module_forward_packed(x, prepared, *, batch_tile=1024,
                                    out_dtype=jnp.bfloat16):
    """x: (B, INPUT_DIM), ideally bf16 (f32 also accepted).
    prepared: output of prepare_params().
    Returns (recon (B,128), packed (B,128)) with latent in lanes 0:32 and
    logits in lanes 32:37 of `packed`, both in out_dtype."""
    B, D = x.shape
    assert D == INPUT_DIM
    assert batch_tile >= 16 and batch_tile % 16 == 0

    # Clamp the tile to the batch; default 1024 amortizes the ~0.35us/step cost on
    # v5e/v6e (pass 2048-4096 on v7x for large B).
    bt = min(batch_tile, _round_up(B, 16))
    # v7x megacore: ensure >=2 grid steps when there is enough work for two cores.
    if B > 512 and pl.cdiv(B, bt) < 2:
        bt = _round_up(pl.cdiv(B, 2), 16)
    grid = (pl.cdiv(B, bt),)   # partial trailing block handled by Pallas (row-independent)

    def const_spec(shape):
        # Tiny, grid-invariant params: full array every step, constant index map.
        return pl.BlockSpec(shape, lambda i: (0, 0))

    in_specs = [pl.BlockSpec((bt, INPUT_DIM), lambda i: (i, 0))]
    args = [x]
    for name in _PARAM_ORDER:
        p = prepared[name]
        in_specs.append(const_spec(p.shape))
        args.append(p)

    out_specs = [
        pl.BlockSpec((bt, INPUT_DIM), lambda i: (i, 0)),    # recon  (128 lanes, dense vst)
        pl.BlockSpec((bt, PACK_WIDTH), lambda i: (i, 0)),   # packed (128 lanes, dense vst)
    ]
    out_shape = (
        jax.ShapeDtypeStruct((B, INPUT_DIM), out_dtype),
        jax.ShapeDtypeStruct((B, PACK_WIDTH), out_dtype),
    )

    recon, packed = pl.pallas_call(
        _aux_kernel,
        out_shape=out_shape,
        grid=grid,
        in_specs=in_specs,
        out_specs=out_specs,
        compiler_params=pltpu.CompilerParams(
            dimension_semantics=("parallel",),   # batch axis: megacore-shardable
        ),
    )(*args)
    return recon, packed


def auxiliary_module_forward(x, prepared, **kwargs):
    """Module-interface wrapper returning (latent, recon, logits). Consumers that
    can work on the packed slab directly should use auxiliary_module_forward_packed
    to skip the two slice copies below."""
    recon, packed = auxiliary_module_forward_packed(x, prepared, **kwargs)
    latent = packed[:, :LATENT_DIM]
    logits = packed[:, LATENT_DIM:LATENT_DIM + NUM_CLASSES]
    return latent, recon, logits


def init_params(key):
    """Deterministic init matching PyTorch Linear shapes (stored transposed: (in, out))."""
    dims = [
        ("w1", (INPUT_DIM, HIDDEN_FE)), ("b1", (1, HIDDEN_FE)),
        ("w2", (HIDDEN_FE, LATENT_DIM)), ("b2", (1, LATENT_DIM)),
        ("w3", (LATENT_DIM, HIDDEN_RC)), ("b3", (1, HIDDEN_RC)),
        ("w4", (HIDDEN_RC, INPUT_DIM)), ("b4", (1, INPUT_DIM)),
        ("w5", (LATENT_DIM, HIDDEN_CL)), ("b5", (1, HIDDEN_CL)),
        ("w6", (HIDDEN_CL, NUM_CLASSES)), ("b6", (1, NUM_CLASSES)),
    ]
    params = {}
    for name, shape in dims:
        key, sub = jax.random.split(key)
        fan_in = shape[0] if name.startswith("w") else shape[1]
        scale = 1.0 / jnp.sqrt(jnp.float32(fan_in))
        params[name] = jax.random.uniform(sub, shape, jnp.float32, -scale, scale)
    return params


def reference_forward_f32(x, p):
    """Pure-f32 JAX reference (original PyTorch module semantics)."""
    x = x.astype(jnp.float32)
    h1 = jnp.maximum(x @ p["w1"] + p["b1"], 0.0)
    latent = h1 @ p["w2"] + p["b2"]
    h2 = jnp.maximum(latent @ p["w3"] + p["b3"], 0.0)
    recon = h2 @ p["w4"] + p["b4"]
    h3 = jnp.maximum(latent @ p["w5"] + p["b5"], 0.0)
    logits = h3 @ p["w6"] + p["b6"]
    return latent, recon, logits


def reference_forward_matched(x, p, out_dtype=jnp.bfloat16):
    """Precision-matched reference: bf16 MXU operands, f32 accumulation/elementwise,
    bf16-rounded outputs (mirrors the kernel's math exactly; the zero-padded weight
    rows/cols in the kernel contribute exact zeros)."""
    bf = jnp.bfloat16
    w = {k: v.astype(bf) for k, v in p.items() if k.startswith("w")}
    x16 = x.astype(bf)
    h1 = jnp.maximum(jnp.dot(x16, w["w1"], preferred_element_type=jnp.float32) + p["b1"], 0.0).astype(bf)
    latent = jnp.dot(h1, w["w2"], preferred_element_type=jnp.float32) + p["b2"]
    lat16 = latent.astype(bf)
    h2 = jnp.maximum(jnp.dot(lat16, w["w3"], preferred_element_type=jnp.float32) + p["b3"], 0.0).astype(bf)
    recon = jnp.dot(h2, w["w4"], preferred_element_type=jnp.float32) + p["b4"]
    h3 = jnp.maximum(jnp.dot(lat16, w["w5"], preferred_element_type=jnp.float32) + p["b5"], 0.0).astype(bf)
    logits = jnp.dot(h3, w["w6"], preferred_element_type=jnp.float32) + p["b6"]
    cast = lambda a: a.astype(out_dtype).astype(jnp.float32)
    return cast(latent), cast(recon), cast(logits)


if __name__ == "__main__":
    key = jax.random.PRNGKey(0)
    key, pkey, xkey = jax.random.split(key, 3)

    params = init_params(pkey)
    prepared = prepare_params(params)      # one-time bf16 cast + lane packing

    B = 64  # small smoke-test batch; wrapper handles any B
    x_f32 = jax.random.normal(xkey, (B, INPUT_DIM), jnp.float32)
    x = x_f32.astype(jnp.bfloat16)         # cast where produced: halves input HBM traffic

    latent, recon, logits = auxiliary_module_forward(x, prepared, batch_tile=1024)
    jax.block_until_ready((latent, recon, logits))

    assert latent.shape == (B, LATENT_DIM)
    assert recon.shape == (B, INPUT_DIM)
    assert logits.shape == (B, NUM_CLASSES)

    lat32 = latent.astype(jnp.float32)
    rec32 = recon.astype(jnp.float32)
    log32 = logits.astype(jnp.float32)

    # Tight check against the precision-matched (bf16 operand, bf16 output) reference.
    lat_m, rec_m, log_m = reference_forward_matched(x, params)
    assert jnp.allclose(lat32, lat_m, atol=2e-2, rtol=2e-2)
    assert jnp.allclose(rec32, rec_m, atol=2e-2, rtol=2e-2)
    assert jnp.allclose(log32, log_m, atol=2e-2, rtol=2e-2)

    # Looser semantic check against the full-f32 reference (bf16 rounding only).
    lat_f, rec_f, log_f = reference_forward_f32(x_f32, params)
    assert jnp.allclose(lat32, lat_f, atol=1e-1, rtol=1e-1)
    assert jnp.allclose(rec32, rec_f, atol=1e-1, rtol=1e-1)
    assert jnp.allclose(log32, log_f, atol=1e-1, rtol=1e-1)

    print("KERNEL_OK")
</pallas_src>

<mosaic_0001>
module attributes {stable_mosaic.version = 11 : i64} {
  func.func @_aux_kernel(%arg0: i32, %arg1: memref<64x128xbf16, #tpu.memory_space<vmem>>, %arg2: memref<128x64xbf16, #tpu.memory_space<vmem>>, %arg3: memref<1x64xf32, #tpu.memory_space<vmem>>, %arg4: memref<64x128xbf16, #tpu.memory_space<vmem>>, %arg5: memref<1x128xf32, #tpu.memory_space<vmem>>, %arg6: memref<128x64xbf16, #tpu.memory_space<vmem>>, %arg7: memref<1x64xf32, #tpu.memory_space<vmem>>, %arg8: memref<64x128xbf16, #tpu.memory_space<vmem>>, %arg9: memref<1x128xf32, #tpu.memory_space<vmem>>, %arg10: memref<128x16xbf16, #tpu.memory_space<vmem>>, %arg11: memref<1x16xf32, #tpu.memory_space<vmem>>, %arg12: memref<16x128xbf16, #tpu.memory_space<vmem>>, %arg13: memref<1x128xf32, #tpu.memory_space<vmem>>, %arg14: memref<64x128xbf16, #tpu.memory_space<vmem>>, %arg15: memref<64x128xbf16, #tpu.memory_space<vmem>>) attributes {dimension_semantics = [#tpu.dimension_semantics<parallel>], iteration_bounds = array<i64: 1>, scalar_prefetch = 0 : i64, scratch_operands = 0 : i64, tpu.core_type = #tpu.core_type<tc>, window_params = [{transform_indices = @transform_0, window_bounds = array<i64: 64, 128>}, {pipeline_mode = #tpu.pipeline_mode<synchronous>, transform_indices = @transform_1, window_bounds = array<i64: 128, 64>}, {pipeline_mode = #tpu.pipeline_mode<synchronous>, transform_indices = @transform_2, window_bounds = array<i64: 1, 64>}, {pipeline_mode = #tpu.pipeline_mode<synchronous>, transform_indices = @transform_3, window_bounds = array<i64: 64, 128>}, {pipeline_mode = #tpu.pipeline_mode<synchronous>, transform_indices = @transform_4, window_bounds = array<i64: 1, 128>}, {pipeline_mode = #tpu.pipeline_mode<synchronous>, transform_indices = @transform_5, window_bounds = array<i64: 128, 64>}, {pipeline_mode = #tpu.pipeline_mode<synchronous>, transform_indices = @transform_6, window_bounds = array<i64: 1, 64>}, {pipeline_mode = #tpu.pipeline_mode<synchronous>, transform_indices = @transform_7, window_bounds = array<i64: 64, 128>}, {pipeline_mode = #tpu.pipeline_mode<synchronous>, transform_indices = @transform_8, window_bounds = array<i64: 1, 128>}, {pipeline_mode = #tpu.pipeline_mode<synchronous>, transform_indices = @transform_9, window_bounds = array<i64: 128, 16>}, {pipeline_mode = #tpu.pipeline_mode<synchronous>, transform_indices = @transform_10, window_bounds = array<i64: 1, 16>}, {pipeline_mode = #tpu.pipeline_mode<synchronous>, transform_indices = @transform_11, window_bounds = array<i64: 16, 128>}, {pipeline_mode = #tpu.pipeline_mode<synchronous>, transform_indices = @transform_12, window_bounds = array<i64: 1, 128>}, {transform_indices = @transform_13, window_bounds = array<i64: 64, 128>}, {transform_indices = @transform_14, window_bounds = array<i64: 64, 128>}]} {
    %c0 = arith.constant 0 : index
    %c0_0 = arith.constant 0 : index
    %0 = vector.load %arg1[%c0, %c0_0] : memref<64x128xbf16, #tpu.memory_space<vmem>>, vector<64x128xbf16>
    %c0_1 = arith.constant 0 : index
    %c0_2 = arith.constant 0 : index
    %1 = vector.load %arg2[%c0_1, %c0_2] : memref<128x64xbf16, #tpu.memory_space<vmem>>, vector<128x64xbf16>
    %cst = arith.constant dense<0.000000e+00> : vector<64x64xf32>
    %2 = tpu.matmul %0, %1, %cst {dimension_numbers = #tpu.dot_dimension_numbers<[1], [0], [0], [1], [0, 0, 1, 1], [], []>} : vector<64x128xbf16>, vector<128x64xbf16>, vector<64x64xf32> -> vector<64x64xf32>
    %c0_3 = arith.constant 0 : index
    %c0_4 = arith.constant 0 : index
    %3 = vector.load %arg3[%c0_3, %c0_4] : memref<1x64xf32, #tpu.memory_space<vmem>>, vector<1x64xf32>
    %4 = vector.broadcast %3 : vector<1x64xf32> to vector<64x64xf32>
    %5 = arith.addf %2, %4 : vector<64x64xf32>
    %cst_5 = arith.constant 0.000000e+00 : f32
    %6 = vector.broadcast %cst_5 : f32 to vector<64x64xf32>
    %7 = arith.maximumf %5, %6 : vector<64x64xf32>
    %8 = arith.truncf %7 : vector<64x64xf32> to vector<64x64xbf16>
    %c0_6 = arith.constant 0 : index
    %c0_7 = arith.constant 0 : index
    %9 = vector.load %arg4[%c0_6, %c0_7] : memref<64x128xbf16, #tpu.memory_space<vmem>>, vector<64x128xbf16>
    %cst_8 = arith.constant dense<0.000000e+00> : vector<64x128xf32>
    %10 = tpu.matmul %8, %9, %cst_8 {dimension_numbers = #tpu.dot_dimension_numbers<[1], [0], [0], [1], [0, 0, 1, 1], [], []>} : vector<64x64xbf16>, vector<64x128xbf16>, vector<64x128xf32> -> vector<64x128xf32>
    %c0_9 = arith.constant 0 : index
    %c0_10 = arith.constant 0 : index
    %11 = vector.load %arg5[%c0_9, %c0_10] : memref<1x128xf32, #tpu.memory_space<vmem>>, vector<1x128xf32>
    %12 = vector.broadcast %11 : vector<1x128xf32> to vector<64x128xf32>
    %13 = arith.addf %10, %12 : vector<64x128xf32>
    %14 = arith.truncf %13 : vector<64x128xf32> to vector<64x128xbf16>
    %c0_11 = arith.constant 0 : index
    %c0_12 = arith.constant 0 : index
    %15 = vector.load %arg6[%c0_11, %c0_12] : memref<128x64xbf16, #tpu.memory_space<vmem>>, vector<128x64xbf16>
    %cst_13 = arith.constant dense<0.000000e+00> : vector<64x64xf32>
    %16 = tpu.matmul %14, %15, %cst_13 {dimension_numbers = #tpu.dot_dimension_numbers<[1], [0], [0], [1], [0, 0, 1, 1], [], []>} : vector<64x128xbf16>, vector<128x64xbf16>, vector<64x64xf32> -> vector<64x64xf32>
    %c0_14 = arith.constant 0 : index
    %c0_15 = arith.constant 0 : index
    %17 = vector.load %arg7[%c0_14, %c0_15] : memref<1x64xf32, #tpu.memory_space<vmem>>, vector<1x64xf32>
    %18 = vector.broadcast %17 : vector<1x64xf32> to vector<64x64xf32>
    %19 = arith.addf %16, %18 : vector<64x64xf32>
    %cst_16 = arith.constant 0.000000e+00 : f32
    %20 = vector.broadcast %cst_16 : f32 to vector<64x64xf32>
    %21 = arith.maximumf %19, %20 : vector<64x64xf32>
    %22 = arith.truncf %21 : vector<64x64xf32> to vector<64x64xbf16>
    %c0_17 = arith.constant 0 : index
    %c0_18 = arith.constant 0 : index
    %23 = vector.load %arg8[%c0_17, %c0_18] : memref<64x128xbf16, #tpu.memory_space<vmem>>, vector<64x128xbf16>
    %cst_19 = arith.constant dense<0.000000e+00> : vector<64x128xf32>
    %24 = tpu.matmul %22, %23, %cst_19 {dimension_numbers = #tpu.dot_dimension_numbers<[1], [0], [0], [1], [0, 0, 1, 1], [], []>} : vector<64x64xbf16>, vector<64x128xbf16>, vector<64x128xf32> -> vector<64x128xf32>
    %c0_20 = arith.constant 0 : index
    %c0_21 = arith.constant 0 : index
    %25 = vector.load %arg9[%c0_20, %c0_21] : memref<1x128xf32, #tpu.memory_space<vmem>>, vector<1x128xf32>
    %26 = vector.broadcast %25 : vector<1x128xf32> to vector<64x128xf32>
    %27 = arith.addf %24, %26 : vector<64x128xf32>
    %28 = arith.truncf %27 : vector<64x128xf32> to vector<64x128xbf16>
    %c0_22 = arith.constant 0 : index
    %c0_23 = arith.constant 0 : index
    %29 = vector.load %arg14[%c0_22, %c0_23] : memref<64x128xbf16, #tpu.memory_space<vmem>>, vector<64x128xbf16>
    tpu.vector_store %arg14[%c0_22, %c0_23], %28 {strides = array<i32>} : memref<64x128xbf16, #tpu.memory_space<vmem>>, vector<64x128xbf16>,
    %c0_24 = arith.constant 0 : index
    %c0_25 = arith.constant 0 : index
    %30 = vector.load %arg10[%c0_24, %c0_25] : memref<128x16xbf16, #tpu.memory_space<vmem>>, vector<128x16xbf16>
    %cst_26 = arith.constant dense<0.000000e+00> : vector<64x16xf32>
    %31 = tpu.matmul %14, %30, %cst_26 {dimension_numbers = #tpu.dot_dimension_numbers<[1], [0], [0], [1], [0, 0, 1, 1], [], []>} : vector<64x128xbf16>, vector<128x16xbf16>, vector<64x16xf32> -> vector<64x16xf32>
    %c0_27 = arith.constant 0 : index
    %c0_28 = arith.constant 0 : index
    %32 = vector.load %arg11[%c0_27, %c0_28] : memref<1x16xf32, #tpu.memory_space<vmem>>, vector<1x16xf32>
    %33 = vector.broadcast %32 : vector<1x16xf32> to vector<64x16xf32>
    %34 = arith.addf %31, %33 : vector<64x16xf32>
    %cst_29 = arith.constant 0.000000e+00 : f32
    %35 = vector.broadcast %cst_29 : f32 to vector<64x16xf32>
    %36 = arith.maximumf %34, %35 : vector<64x16xf32>
    %37 = arith.truncf %36 : vector<64x16xf32> to vector<64x16xbf16>
    %c0_30 = arith.constant 0 : index
    %c0_31 = arith.constant 0 : index
    %38 = vector.load %arg12[%c0_30, %c0_31] : memref<16x128xbf16, #tpu.memory_space<vmem>>, vector<16x128xbf16>
    %cst_32 = arith.constant dense<0.000000e+00> : vector<64x128xf32>
    %39 = tpu.matmul %37, %38, %cst_32 {dimension_numbers = #tpu.dot_dimension_numbers<[1], [0], [0], [1], [0, 0, 1, 1], [], []>} : vector<64x16xbf16>, vector<16x128xbf16>, vector<64x128xf32> -> vector<64x128xf32>
    %c0_33 = arith.constant 0 : index
    %c0_34 = arith.constant 0 : index
    %40 = vector.load %arg13[%c0_33, %c0_34] : memref<1x128xf32, #tpu.memory_space<vmem>>, vector<1x128xf32>
    %41 = vector.broadcast %40 : vector<1x128xf32> to vector<64x128xf32>
    %42 = arith.addf %39, %41 : vector<64x128xf32>
    %43 = arith.addf %13, %42 : vector<64x128xf32>
    %44 = arith.truncf %43 : vector<64x128xf32> to vector<64x128xbf16>
    %c0_35 = arith.constant 0 : index
    %c0_36 = arith.constant 0 : index
    %45 = vector.load %arg15[%c0_35, %c0_36] : memref<64x128xbf16, #tpu.memory_space<vmem>>, vector<64x128xbf16>
    tpu.vector_store %arg15[%c0_35, %c0_36], %44 {strides = array<i32>} : memref<64x128xbf16, #tpu.memory_space<vmem>>, vector<64x128xbf16>,
    return
  }
  func.func @transform_0(%arg0: i32) -> (i32, i32) {
    %c0_i32 = arith.constant 0 : i32
    %c0_i32_0 = arith.constant 0 : i32
    return %arg0, %c0_i32 : i32, i32
  }
  func.func @transform_1(%arg0: i32) -> (i32, i32) {
    %c0_i32 = arith.constant 0 : i32
    %c0_i32_0 = arith.constant 0 : i32
    %c0_i32_1 = arith.constant 0 : i32
    return %c0_i32, %c0_i32_0 : i32, i32
  }
  func.func @transform_2(%arg0: i32) -> (i32, i32) {
    %c0_i32 = arith.constant 0 : i32
    %c0_i32_0 = arith.constant 0 : i32
    %c0_i32_1 = arith.constant 0 : i32
    return %c0_i32, %c0_i32_0 : i32, i32
  }
  func.func @transform_3(%arg0: i32) -> (i32, i32) {
    %c0_i32 = arith.constant 0 : i32
    %c0_i32_0 = arith.constant 0 : i32
    %c0_i32_1 = arith.constant 0 : i32
    return %c0_i32, %c0_i32_0 : i32, i32
  }
  func.func @transform_4(%arg0: i32) -> (i32, i32) {
    %c0_i32 = arith.constant 0 : i32
    %c0_i32_0 = arith.constant 0 : i32
    %c0_i32_1 = arith.constant 0 : i32
    return %c0_i32, %c0_i32_0 : i32, i32
  }
  func.func @transform_5(%arg0: i32) -> (i32, i32) {
    %c0_i32 = arith.constant 0 : i32
    %c0_i32_0 = arith.constant 0 : i32
    %c0_i32_1 = arith.constant 0 : i32
    return %c0_i32, %c0_i32_0 : i32, i32
  }
  func.func @transform_6(%arg0: i32) -> (i32, i32) {
    %c0_i32 = arith.constant 0 : i32
    %c0_i32_0 = arith.constant 0 : i32
    %c0_i32_1 = arith.constant 0 : i32
    return %c0_i32, %c0_i32_0 : i32, i32
  }
  func.func @transform_7(%arg0: i32) -> (i32, i32) {
    %c0_i32 = arith.constant 0 : i32
    %c0_i32_0 = arith.constant 0 : i32
    %c0_i32_1 = arith.constant 0 : i32
    return %c0_i32, %c0_i32_0 : i32, i32
  }
  func.func @transform_8(%arg0: i32) -> (i32, i32) {
    %c0_i32 = arith.constant 0 : i32
    %c0_i32_0 = arith.constant 0 : i32
    %c0_i32_1 = arith.constant 0 : i32
    return %c0_i32, %c0_i32_0 : i32, i32
  }
  func.func @transform_9(%arg0: i32) -> (i32, i32) {
    %c0_i32 = arith.constant 0 : i32
    %c0_i32_0 = arith.constant 0 : i32
    %c0_i32_1 = arith.constant 0 : i32
    return %c0_i32, %c0_i32_0 : i32, i32
  }
  func.func @transform_10(%arg0: i32) -> (i32, i32) {
    %c0_i32 = arith.constant 0 : i32
    %c0_i32_0 = arith.constant 0 : i32
    %c0_i32_1 = arith.constant 0 : i32
    return %c0_i32, %c0_i32_0 : i32, i32
  }
  func.func @transform_11(%arg0: i32) -> (i32, i32) {
    %c0_i32 = arith.constant 0 : i32
    %c0_i32_0 = arith.constant 0 : i32
    %c0_i32_1 = arith.constant 0 : i32
    return %c0_i32, %c0_i32_0 : i32, i32
  }
  func.func @transform_12(%arg0: i32) -> (i32, i32) {
    %c0_i32 = arith.constant 0 : i32
    %c0_i32_0 = arith.constant 0 : i32
    %c0_i32_1 = arith.constant 0 : i32
    return %c0_i32, %c0_i32_0 : i32, i32
  }
  func.func @transform_13(%arg0: i32) -> (i32, i32) {
    %c0_i32 = arith.constant 0 : i32
    %c0_i32_0 = arith.constant 0 : i32
    return %arg0, %c0_i32 : i32, i32
  }
  func.func @transform_14(%arg0: i32) -> (i32, i32) {
    %c0_i32 = arith.constant 0 : i32
    %c0_i32_0 = arith.constant 0 : i32
    return %arg0, %c0_i32 : i32, i32
  }
}

</mosaic_0001>

<bundles_post_ra>
// kernel: tpu_custom_call.1
= control target key start
LH: loop header
LB: loop body
LE: loop exit
PB: predicated region body
PF: predicated region fallthrough
CT: control target
= control target key end

     0   :  { %20 = vsyncpa [#allocation3], 0  ;;  %s1274_s0 = inlined_call_operand.vmem [shape: bf16[64,128], index: 0, kind: input, shape index: {}]   ;;  %s1275_s1 = inlined_call_operand.vmem [shape: bf16[128,64], index: 1, kind: input, shape index: {}]   ;;  %s1276_s2 = inlined_call_operand.vmem [shape: f32[1,64], index: 2, kind: input, shape index: {}]   ;;  %s1277_s3 = inlined_call_operand.vmem [shape: bf16[64,128], index: 3, kind: input, shape index: {}]   ;;  %s1278_s4 = inlined_call_operand.vmem [shape: f32[1,128], index: 4, kind: input, shape index: {}]   ;;  %s1279_s5 = inlined_call_operand.vmem [shape: bf16[128,64], index: 5, kind: input, shape index: {}]   ;;  %s1280_s6 = inlined_call_operand.vmem [shape: f32[1,64], index: 6, kind: input, shape index: {}]   ;;  %s1281_s7 = inlined_call_operand.vmem [shape: bf16[64,128], index: 7, kind: input, shape index: {}]   ;;  %s1282_s8 = inlined_call_operand.vmem [shape: f32[1,128], index: 8, kind: input, shape index: {}]   ;;  %s1283_s9 = inlined_call_operand.vmem [shape: bf16[128,16], index: 9, kind: input, shape index: {}]   ;;  %s1284_s10 = inlined_call_operand.vmem [shape: f32[1,16], index: 10, kind: input, shape index: {}]   ;;  %s1285_s11 = inlined_call_operand.vmem [shape: bf16[16,128], index: 11, kind: input, shape index: {}]   ;;  %s1286_s12 = inlined_call_operand.vmem [shape: f32[1,128], index: 12, kind: input, shape index: {}]   ;;  %s1287_s13 = inlined_call_operand.hbm [shape: bf16[64,128], index: 13, kind: output, shape index: {0}]   ;;  %s1288_s14 = inlined_call_operand.hbm [shape: bf16[64,128], index: 14, kind: output, shape index: {1}]  }
   0x1   :  { %v868_v0 = vld [vmem:[%s1275_s1 + $0x38] sm:$0xff]  ;;  %v867_v1 = vld [vmem:[%s1275_s1 + $0x30] sm:$0xff] }
   0x2   :  { %149 = vmatpush.bf16.msra.mxu0 %v868_v0 }
   0x3   :  { %21 = vsyncpa [#allocation5], 0  ;;  %v866_v2 = vld [vmem:[%s1275_s1 + $0x28] sm:$0xff]  ;;  %v865_v3 = vld [vmem:[%s1275_s1 + $0x20] sm:$0xff]  ;;  %vm226_vm0 = vcmask 523264   ;;  %vm595_vm1 = vcmask 130048  }
   0x4   :  { %v864_v4 = vld [vmem:[%s1275_s1 + $0x18] sm:$0xff]  ;;  %v863_v5 = vld [vmem:[%s1275_s1 + $0x10] sm:$0xff]  ;;  %v862_v6 = vld [vmem:[%s1275_s1 + $0x8] sm:$0xff]  ;;  %s1010_s30 = smov [#allocation2]   ;;  %s667_s17 = sshll.u32 %s1287_s13, 4  ;;  %s668_s17 = int_to_ptr.hbm [resolvable:$true] %s667_s17 }
   0x5   :  { %v861_v7 = vld [vmem:[%s1275_s1] sm:$0xff]  ;;  %v858_v9 = vld [vmem:[%s1274_s0 + $0x8] sm:$0xff]  ;;  %v872_v10 = vld [vmem:[%s1277_s3 + $0x18] sm:$0xff]  ;;  %s1011_s18 = smov 64   ;;  %s1012_s19 = smov 4  }
   0x6   :  { %150 = vmatpush.bf16.msra.mxu0 %v867_v1  ;;  %v857_v8 = vld [vmem:[%s1274_s0] sm:$0xff]  ;;  %v871_v11 = vld [vmem:[%s1277_s3 + $0x10] sm:$0xff]  ;;  %940 = vmatpush.bf16.msra.mxu1 %v872_v10  ;;  %v870_v12 = vld [vmem:[%s1277_s3 + $0x8] sm:$0xff]  ;;  %s680_s23 = sshll.u32 %s1288_s14, 4  ;;  %s681_s23 = int_to_ptr.hbm [resolvable:$true] %s680_s23 }
   0x7   :  { %v869_v13 = vld [vmem:[%s1277_s3] sm:$0xff]  ;;  %v859_v14 = vld [vmem:[%s1274_s0 + $0x10] sm:$0xff]  ;;  %v860_v15 = vld [vmem:[%s1274_s0 + $0x18] sm:$0xff] }
   0x8   :  { %v952_v17 = vld [vmem:[%s1276_s2] ss:$0 sm:$0xff]  ;;  %v880_v31 = vld [vmem:[%s1279_s5 + $0x38] sm:$0xff]  ;;  %v879_v34 = vld [vmem:[%s1279_s5 + $0x30] sm:$0xff] }
   0x9   :  { %v892_v32 = vld [vmem:[%s1283_s9 + $0x38] sm:$0xff]  ;;  %340 = vmatpush.bf16.msra.mxu2 %v880_v31  ;;  %v891_v35 = vld [vmem:[%s1283_s9 + $0x30] sm:$0xff]  ;;  %v878_v36 = vld [vmem:[%s1279_s5 + $0x28] sm:$0xff] }
   0xa   :  { %151 = vmatpush.bf16.msra.mxu0 %v866_v2  ;;  %941 = vmatpush.bf16.msra.mxu1 %v871_v11  ;;  %v890_v37 = vld [vmem:[%s1283_s9 + $0x28] sm:$0xff]  ;;  %v877_v41 = vld [vmem:[%s1279_s5 + $0x20] sm:$0xff]  ;;  %v876_v46 = vld [vmem:[%s1279_s5 + $0x18] sm:$0xff] }
   0xb   :  { %v889_v42 = vld [vmem:[%s1283_s9 + $0x20] sm:$0xff]  ;;  %v888_v47 = vld [vmem:[%s1283_s9 + $0x18] sm:$0xff]  ;;  %v875_v55 = vld [vmem:[%s1279_s5 + $0x10] sm:$0xff] }
   0xc   :  { %v887_v56 = vld [vmem:[%s1283_s9 + $0x10] sm:$0xff]  ;;  %v874_v57 = vld [vmem:[%s1279_s5 + $0x8] sm:$0xff]  ;;  %v873_v59 = vld [vmem:[%s1279_s5] sm:$0xff] }
   0xd   :  { %341 = vmatpush.bf16.msra.mxu2 %v879_v34  ;;  %v886_v58 = vld [vmem:[%s1283_s9 + $0x8] sm:$0xff]  ;;  %v885_v60 = vld [vmem:[%s1283_s9] sm:$0xff] }
   0xe   :  { %152 = vmatpush.bf16.msra.mxu0 %v865_v3  ;;  %942 = vmatpush.bf16.msra.mxu1 %v870_v12  ;;  %v953_v62 = vld [vmem:[%s1278_s4] ss:$0 sm:$0xff] }
  0x11   :  { %342 = vmatpush.bf16.msra.mxu2 %v878_v36 }
  0x12   :  { %153 = vmatpush.bf16.msra.mxu0 %v864_v4  ;;  %943 = vmatpush.bf16.msra.mxu1 %v869_v13 }
  0x15   :  { %343 = vmatpush.bf16.msra.mxu2 %v877_v41 }
  0x16   :  { %154 = vmatpush.bf16.msra.mxu0 %v863_v5  ;;  %542 = vmatpush.bf16.msrb.mxu1 %v892_v32 }
  0x19   :  { %344 = vmatpush.bf16.msra.mxu2 %v876_v46 }
  0x1a   :  { %155 = vmatpush.bf16.msra.mxu0 %v862_v6  ;;  %543 = vmatpush.bf16.msrb.mxu1 %v891_v35 }
  0x1d   :  { %345 = vmatpush.bf16.msra.mxu2 %v875_v55  ;;  %v954_v55 = vld [vmem:[%s1284_s10] ss:$0 sm:$0xff] }
  0x1e   :  { %156 = vmatpush.bf16.msra.mxu0 %v861_v7  ;;  %544 = vmatpush.bf16.msrb.mxu1 %v890_v37 }
  0x21   :  { %157 = vmatmul.bf16.vlgmr.msra.gmra.mxu0 %v857_v8  ;;  %346 = vmatpush.bf16.msra.mxu2 %v874_v57 }
  0x22   :  { %243 = vmatpush.bf16.msrb.mxu0 %v872_v10  ;;  %545 = vmatpush.bf16.msrb.mxu1 %v889_v42 }
  0x25   :  { %347 = vmatpush.bf16.msra.mxu2 %v873_v59 }
  0x26   :  { %244 = vmatpush.bf16.msrb.mxu0 %v871_v11  ;;  %546 = vmatpush.bf16.msrb.mxu1 %v888_v47 }
  0x2a   :  { %245 = vmatpush.bf16.msrb.mxu0 %v870_v12  ;;  %547 = vmatpush.bf16.msrb.mxu1 %v887_v56 }
  0x2e   :  { %246 = vmatpush.bf16.msrb.mxu0 %v869_v13  ;;  %548 = vmatpush.bf16.msrb.mxu1 %v886_v58 }
  0x31   :  { %162 = vmatmul.bf16.gmra.mxu0 %v858_v9 }
  0x32   :  { %549 = vmatpush.bf16.msrb.mxu1 %v885_v60 }
  0x41   :  { %167 = vmatmul.bf16.gmra.mxu0 %v859_v14 }
  0x51   :  { %172 = vmatmul.bf16.gmra.mxu0 %v860_v15 }
  0x9e   :  { %v158_v16 = vpop.f32.mrf.mxu0 }
  0x9f   :  { %v159_v18 = vadd.f32 %v952_v17, %v158_v16 }
  0xa1   :  { %v178_v21 = vmax.f32 %v159_v18, 0.0  ;;  %v884_v18 = vld [vmem:[%s1281_s7 + $0x18] sm:$0xff] }
  0xa2   :  { %433 = vmatpush.bf16.msrb.mxu2 %v884_v18  ;;  %944 = vmatpush.bf16.msra.mxu3 %v884_v18 }
  0xa6   :  { %v160_v19 = vpop.f32.mrf.mxu0 }
  0xa7   :  { %v161_v20 = vadd.f32 %v952_v17, %v160_v19  ;;  %v883_v19 = vld [vmem:[%s1281_s7 + $0x10] sm:$0xff] }
  0xa8   :  { %434 = vmatpush.bf16.msrb.mxu2 %v883_v19  ;;  %945 = vmatpush.bf16.msra.mxu3 %v883_v19 }
  0xa9   :  { %v179_v22 = vmax.f32 %v161_v20, 0.0  ;;  %v882_v20 = vld [vmem:[%s1281_s7 + $0x8] sm:$0xff] }
  0xab   :  { %v186_v23 = vpack.c.bf16 %v179_v22, %v178_v21  ;;  %v881_v21 = vld [vmem:[%s1281_s7] sm:$0xff] }
  0xac   :  { %435 = vmatpush.bf16.msrb.mxu2 %v882_v20  ;;  %946 = vmatpush.bf16.msra.mxu3 %v882_v20  ;;  %v893_v22 = vld [vmem:[%s1285_s11] sm:$0xff] }
  0xad   :  { %761 = vmatmul.msk.bf16.vlgmr.msrb.gmra.mxu0 %vm226_vm0, %v186_v23 }
  0xae   :  { %v163_v24 = vpop.f32.mrf.mxu0 }
  0xaf   :  { %v164_v25 = vadd.f32 %v952_v17, %v163_v24  ;;  %v955_v24 = vld [vmem:[%s1280_s6] ss:$0 sm:$0xff] }
  0xb0   :  { %436 = vmatpush.bf16.msrb.mxu2 %v881_v21  ;;  %947 = vmatpush.bf16.msra.mxu3 %v881_v21 }
  0xb1   :  { %v180_v28 = vmax.f32 %v164_v25, 0.0 }
  0xb4   :  { %615 = vmatpush.bf16.msrb.mxu3 %v893_v22 }
  0xb6   :  { %v165_v26 = vpop.f32.mrf.mxu0 }
  0xb7   :  { %v166_v27 = vadd.f32 %v952_v17, %v165_v26 }
  0xb9   :  { %v181_v29 = vmax.f32 %v166_v27, 0.0 }
  0xbb   :  { %v187_v30 = vpack.c.bf16 %v181_v29, %v180_v28 }
  0xbd   :  { %762 = vmatmul.msk.bf16.gmra.mxu0 %vm226_vm0, %v187_v30 }
  0xbe   :  { %v168_v33 = vpop.f32.mrf.mxu0 }
  0xbf   :  { %v169_v38 = vadd.f32 %v952_v17, %v168_v33 }
  0xc1   :  { %v182_v43 = vmax.f32 %v169_v38, 0.0 }
  0xc6   :  { %v170_v39 = vpop.f32.mrf.mxu0 }
  0xc7   :  { %v171_v40 = vadd.f32 %v952_v17, %v170_v39 }
  0xc9   :  { %v183_v44 = vmax.f32 %v171_v40, 0.0 }
  0xcb   :  { %v188_v45 = vpack.c.bf16 %v183_v44, %v182_v43 }
  0xcd   :  { %763 = vmatmul.msk.bf16.vlgmr.msra.gmra.mxu1 %vm226_vm0, %v188_v45 }
  0xce   :  { %v173_v48 = vpop.f32.mrf.mxu0 }
  0xcf   :  { %v174_v49 = vadd.f32 %v952_v17, %v173_v48 }
  0xd1   :  { %v184_v52 = vmax.f32 %v174_v49, 0.0 }
  0xd6   :  { %v175_v50 = vpop.f32.mrf.mxu0 }
  0xd7   :  { %v176_v51 = vadd.f32 %v952_v17, %v175_v50 }
  0xd9   :  { %v185_v53 = vmax.f32 %v176_v51, 0.0 }
  0xdb   :  { %v189_v54 = vpack.c.bf16 %v185_v53, %v184_v52 }
  0xdd   :  { %764 = vmatmul.msk.bf16.gmra.mxu1 %vm226_vm0, %v189_v54 }
 0x12a   :  { %v248_v61 = vpop.f32.mrf.mxu0 }
 0x12b   :  { %v1195_v0 = vadd.f32 %v953_v62, %v248_v61 }
 0x132   :  { %v250_v63 = vpop.f32.mrf.mxu0 }
 0x133   :  { %v1197_v1 = vadd.f32 %v953_v62, %v250_v63 }
 0x135   :  { %v268_v2 = vpack.c.bf16 %v1197_v1, %v1195_v0 }
 0x137   :  { %348 = vmatmul.bf16.vlgmr.msra.gmra.mxu2 %v268_v2  ;;  %550 = vmatmul.bf16.vlgmr.msrb.gmra.mxu1 %v268_v2 }
 0x13a   :  { %v253_v3 = vpop.f32.mrf.mxu0 }
 0x13b   :  { %v1201_v5 = vadd.f32 %v953_v62, %v253_v3 }
 0x142   :  { %v255_v4 = vpop.f32.mrf.mxu0 }
 0x143   :  { %v1203_v6 = vadd.f32 %v953_v62, %v255_v4 }
 0x145   :  { %v269_v7 = vpack.c.bf16 %v1203_v6, %v1201_v5 }
 0x147   :  { %353 = vmatmul.bf16.gmra.mxu2 %v269_v7  ;;  %555 = vmatmul.bf16.gmra.mxu1 %v269_v7 }
 0x14a   :  { %v258_v8 = vpop.f32.mrf.mxu1 }
 0x14b   :  { %v1207_v10 = vadd.f32 %v953_v62, %v258_v8 }
 0x152   :  { %v260_v9 = vpop.f32.mrf.mxu1 }
 0x153   :  { %v1209_v11 = vadd.f32 %v953_v62, %v260_v9 }
 0x155   :  { %v270_v12 = vpack.c.bf16 %v1209_v11, %v1207_v10 }
 0x157   :  { %358 = vmatmul.bf16.gmra.mxu2 %v270_v12  ;;  %560 = vmatmul.bf16.gmra.mxu1 %v270_v12 }
 0x15a   :  { %v263_v13 = vpop.f32.mrf.mxu1 }
 0x15b   :  { %v1213_v15 = vadd.f32 %v953_v62, %v263_v13 }
 0x162   :  { %v265_v14 = vpop.f32.mrf.mxu1 }
 0x163   :  { %v1215_v16 = vadd.f32 %v953_v62, %v265_v14 }
 0x165   :  { %v271_v17 = vpack.c.bf16 %v1215_v16, %v1213_v15 }
 0x167   :  { %363 = vmatmul.bf16.gmra.mxu2 %v271_v17  ;;  %565 = vmatmul.bf16.gmra.mxu1 %v271_v17 }
 0x1b4   :  { %v551_v44 = vpop.f32.mrf.mxu1 }
 0x1b5   :  { %v552_v57 = vadd.f32 %v954_v55, %v551_v44 }
 0x1b7   :  { %v571_v60 = vmax.f32 %v552_v57, 0.0 }
 0x1ba   :  { %v349_v23 = vpop.f32.mrf.mxu2 }
 0x1bb   :  { %v350_v25 = vadd.f32 %v955_v24, %v349_v23 }
 0x1bc   :  { %v553_v47 = vpop.f32.mrf.mxu1 }
 0x1bd   :  { %v369_v28 = vmax.f32 %v350_v25, 0.0  ;;  %v554_v56 = vadd.f32 %v954_v55, %v553_v47  ;;  %v957_v47 = vld [vmem:[%s1286_s12] ss:$0 sm:$0xff]  ;;  %s1013_s12 = smov [#allocation4]  }
 0x1be   :  { %s678_s13 = sshll.u32 %s1013_s12, 4  ;;  %s679_s13 = int_to_ptr.vmem [resolvable:$true] %s678_s13 }
 0x1bf   :  { %v572_v58 = vmax.f32 %v554_v56, 0.0 }
 0x1c1   :  { %v579_v61 = vpack.c.bf16 %v572_v58, %v571_v60 }
 0x1c2   :  { %v351_v26 = vpop.f32.mrf.mxu2 }
 0x1c3   :  { %v352_v27 = vadd.f32 %v955_v24, %v351_v26  ;;  %v956_v26 = vld [vmem:[%s1282_s8] ss:$0 sm:$0xff]  ;;  %s665_s8 = sshll.u32 %s1010_s30, 4  ;;  %s666_s8 = int_to_ptr.vmem [resolvable:$true] %s665_s8 }
 0x1c4   :  { %v556_v54 = vpop.f32.mrf.mxu1 }
 0x1c5   :  { %v370_v29 = vmax.f32 %v352_v27, 0.0  ;;  %v557_v2 = vadd.f32 %v954_v55, %v556_v54 }
 0x1c7   :  { %v377_v30 = vpack.c.bf16 %v370_v29, %v369_v28  ;;  %v573_v4 = vmax.f32 %v557_v2, 0.0 }
 0x1c9   :  { %813 = vmatmul.msk.bf16.vlgmr.msrb.gmra.mxu2 %vm226_vm0, %v377_v30 }
 0x1ca   :  { %v354_v31 = vpop.f32.mrf.mxu2 }
 0x1cb   :  { %v355_v32 = vadd.f32 %v955_v24, %v354_v31 }
 0x1cc   :  { %v558_v59 = vpop.f32.mrf.mxu1 }
 0x1cd   :  { %v371_v35 = vmax.f32 %v355_v32, 0.0  ;;  %v559_v63 = vadd.f32 %v954_v55, %v558_v59 }
 0x1cf   :  { %v574_v3 = vmax.f32 %v559_v63, 0.0 }
 0x1d1   :  { %v580_v7 = vpack.c.bf16 %v574_v3, %v573_v4 }
 0x1d2   :  { %v356_v33 = vpop.f32.mrf.mxu2 }
 0x1d3   :  { %v357_v34 = vadd.f32 %v955_v24, %v356_v33 }
 0x1d4   :  { %v561_v62 = vpop.f32.mrf.mxu1 }
 0x1d5   :  { %v372_v36 = vmax.f32 %v357_v34, 0.0  ;;  %v562_v12 = vadd.f32 %v954_v55, %v561_v62 }
 0x1d7   :  { %v378_v37 = vpack.c.bf16 %v372_v36, %v371_v35  ;;  %v575_v17 = vmax.f32 %v562_v12, 0.0 }
 0x1d9   :  { %814 = vmatmul.msk.bf16.vlgmr.msra.gmra.mxu3 %vm226_vm0, %v378_v37 }
 0x1da   :  { %v359_v38 = vpop.f32.mrf.mxu2 }
 0x1db   :  { %v360_v39 = vadd.f32 %v955_v24, %v359_v38 }
 0x1dc   :  { %v563_v8 = vpop.f32.mrf.mxu1 }
 0x1dd   :  { %v373_v42 = vmax.f32 %v360_v39, 0.0  ;;  %v564_v9 = vadd.f32 %v954_v55, %v563_v8 }
 0x1df   :  { %v576_v14 = vmax.f32 %v564_v9, 0.0 }
 0x1e1   :  { %v581_v18 = vpack.c.bf16 %v576_v14, %v575_v17 }
 0x1e2   :  { %v361_v40 = vpop.f32.mrf.mxu2 }
 0x1e3   :  { %v362_v41 = vadd.f32 %v955_v24, %v361_v40 }
 0x1e4   :  { %v566_v13 = vpop.f32.mrf.mxu1 }
 0x1e5   :  { %v374_v43 = vmax.f32 %v362_v41, 0.0  ;;  %v567_v21 = vadd.f32 %v954_v55, %v566_v13 }
 0x1e7   :  { %v379_v45 = vpack.c.bf16 %v374_v43, %v373_v42  ;;  %v577_v23 = vmax.f32 %v567_v21, 0.0 }
 0x1e9   :  { %815 = vmatmul.msk.bf16.gmra.mxu3 %vm226_vm0, %v379_v45 }
 0x1ea   :  { %v364_v46 = vpop.f32.mrf.mxu2 }
 0x1eb   :  { %v365_v48 = vadd.f32 %v955_v24, %v364_v46 }
 0x1ec   :  { %v568_v19 = vpop.f32.mrf.mxu1 }
 0x1ed   :  { %v375_v51 = vmax.f32 %v365_v48, 0.0  ;;  %v569_v20 = vadd.f32 %v954_v55, %v568_v19 }
 0x1ef   :  { %v578_v22 = vmax.f32 %v569_v20, 0.0 }
 0x1f2   :  { %v366_v49 = vpop.f32.mrf.mxu2 }
 0x1f3   :  { %v367_v50 = vadd.f32 %v955_v24, %v366_v49  ;;  %v582_v24 = vpack.c.bf16 %v578_v22, %v577_v23 }
 0x1f5   :  { %v376_v52 = vmax.f32 %v367_v50, 0.0 }
 0x1f7   :  { %v380_v53 = vpack.c.bf16 %v376_v52, %v375_v51 }
 0x1f9   :  { %816 = vmatmul.msk.bf16.gmra.mxu3 %vm226_vm0, %v380_v53 }
 0x209   :  { %853 = vmatmul.msk.bf16.vlgmr.msrb.gmra.mxu3 %vm595_vm1, %v579_v61 }
 0x219   :  { %854 = vmatmul.msk.bf16.gmra.mxu3 %vm595_vm1, %v580_v7 }
 0x229   :  { %855 = vmatmul.msk.bf16.gmra.mxu3 %vm595_vm1, %v581_v18 }
 0x239   :  { %856 = vmatmul.msk.bf16.gmra.mxu3 %vm595_vm1, %v582_v24 }
 0x24c   :  { %v438_v25 = vpop.f32.mrf.mxu2 }
 0x24d   :  { %v439_v28 = vadd.f32 %v956_v26, %v438_v25 }
 0x254   :  { %v440_v27 = vpop.f32.mrf.mxu2 }
 0x255   :  { %v441_v29 = vadd.f32 %v956_v26, %v440_v27 }
 0x257   :  { %v897_v30 = vpack.c.bf16 %v441_v29, %v439_v28 }
 0x259   :  { %898 = vst [vmem:[#allocation2] sm:$0xff] %v897_v30  }
 0x25c   :  { %v443_v31 = vpop.f32.mrf.mxu3 }
 0x25d   :  { %v444_v33 = vadd.f32 %v956_v26, %v443_v31 }
 0x264   :  { %v445_v32 = vpop.f32.mrf.mxu3 }
 0x265   :  { %v446_v34 = vadd.f32 %v956_v26, %v445_v32 }
 0x267   :  { %v902_v35 = vpack.c.bf16 %v446_v34, %v444_v33 }
 0x269   :  { %934 = vst [vmem:[#allocation2 + $0x8] sm:$0xff] %v902_v35  }
 0x26c   :  { %v448_v36 = vpop.f32.mrf.mxu3 }
 0x26d   :  { %v449_v38 = vadd.f32 %v956_v26, %v448_v36 }
 0x274   :  { %v450_v37 = vpop.f32.mrf.mxu3 }
 0x275   :  { %v451_v39 = vadd.f32 %v956_v26, %v450_v37 }
 0x277   :  { %v907_v40 = vpack.c.bf16 %v451_v39, %v449_v38 }
 0x279   :  { %935 = vst [vmem:[#allocation2 + $0x10] sm:$0xff] %v907_v40  }
 0x27c   :  { %v453_v41 = vpop.f32.mrf.mxu3 }
 0x27d   :  { %v454_v43 = vadd.f32 %v956_v26, %v453_v41 }
 0x284   :  { %v455_v42 = vpop.f32.mrf.mxu3 }
 0x285   :  { %v456_v44 = vadd.f32 %v956_v26, %v455_v42 }
 0x287   :  { %v912_v45 = vpack.c.bf16 %v456_v44, %v454_v43 }
 0x289   :  { %936 = vst [vmem:[#allocation2 + $0x18] sm:$0xff] %v912_v45  }
 0x28a   :  { %673 = dma.vmem_to_hbm [thread:$0]  %s666_s8, 512, %s668_s17, [#allocation3], %s1011_s18, %s1011_s18, %s1012_s19  }
 0x28c   :  { %v617_v46 = vpop.f32.mrf.mxu3 }
 0x28d   :  { %v618_v48 = vadd.f32 %v957_v47, %v617_v46 }
 0x28f   :  { %v637_v51 = vadd.f32 %v618_v48, %v1195_v0 }
 0x294   :  { %v619_v49 = vpop.f32.mrf.mxu3 }
 0x295   :  { %v620_v50 = vadd.f32 %v957_v47, %v619_v49 }
 0x297   :  { %v638_v52 = vadd.f32 %v620_v50, %v1197_v1 }
 0x299   :  { %v917_v53 = vpack.c.bf16 %v638_v52, %v637_v51 }
 0x29b   :  { %918 = vst [vmem:[#allocation4] sm:$0xff] %v917_v53  }
 0x29c   :  { %v622_v54 = vpop.f32.mrf.mxu3 }
 0x29d   :  { %v623_v55 = vadd.f32 %v957_v47, %v622_v54 }
 0x29f   :  { %v639_v58 = vadd.f32 %v623_v55, %v1201_v5 }
 0x2a4   :  { %v624_v56 = vpop.f32.mrf.mxu3 }
 0x2a5   :  { %v625_v57 = vadd.f32 %v957_v47, %v624_v56 }
 0x2a7   :  { %v640_v59 = vadd.f32 %v625_v57, %v1203_v6 }
 0x2a9   :  { %v922_v60 = vpack.c.bf16 %v640_v59, %v639_v58 }
 0x2ab   :  { %937 = vst [vmem:[#allocation4 + $0x8] sm:$0xff] %v922_v60  }
 0x2ac   :  { %v627_v61 = vpop.f32.mrf.mxu3 }
 0x2ad   :  { %v628_v62 = vadd.f32 %v957_v47, %v627_v61 }
 0x2af   :  { %v641_v0 = vadd.f32 %v628_v62, %v1207_v10 }
 0x2b4   :  { %v629_v63 = vpop.f32.mrf.mxu3 }
 0x2b5   :  { %v630_v2 = vadd.f32 %v957_v47, %v629_v63 }
 0x2b7   :  { %v642_v1 = vadd.f32 %v630_v2, %v1209_v11 }
 0x2b9   :  { %v927_v3 = vpack.c.bf16 %v642_v1, %v641_v0 }
 0x2bb   :  { %938 = vst [vmem:[#allocation4 + $0x10] sm:$0xff] %v927_v3  }
 0x2bc   :  { %v632_v4 = vpop.f32.mrf.mxu3 }
 0x2bd   :  { %v633_v7 = vadd.f32 %v957_v47, %v632_v4 }
 0x2bf   :  { %v643_v5 = vadd.f32 %v633_v7, %v1213_v15 }
 0x2c4   :  { %v634_v8 = vpop.f32.mrf.mxu3 }
 0x2c5   :  { %v635_v9 = vadd.f32 %v957_v47, %v634_v8 }
 0x2c7   :  { %v644_v6 = vadd.f32 %v635_v9, %v1215_v16 }
 0x2c9   :  { %v932_v12 = vpack.c.bf16 %v644_v6, %v643_v5 }
 0x2cb   :  { %939 = vst [vmem:[#allocation4 + $0x18] sm:$0xff] %v932_v12  }
 0x2cc   :  { %686 = dma.vmem_to_hbm [thread:$0]  %s679_s13, 512, %s681_s23, [#allocation5], %s1011_s18, %s1011_s18, %s1012_s19  }
 0x2cd   :  { %1006 = dma.done.wait [#allocation3], 512  }
 0x2ce   :  { %1007 = vsyncadd [#allocation3], 4294966784 }
 0x2cf   :  { %1008 = dma.done.wait [#allocation5], 512  }
 0x2d0   :  { %1009 = vsyncadd [#allocation5], 4294966784 }
 0x2d1   :  { %695 = vsyncpa [#allocation3], 1 }
 0x2d2   :  { %696 = vsyncpa [#allocation5], 1 }

</bundles_post_ra>
